<compile_context>
chip_gen: v6e
topology: v6e:2x2x1
jax: 0.10.0
libtpu: 0.0.40
codegen_flags: <defaults>
</compile_context>

<pallas_src>
import functools

import numpy as np
import jax
import jax.numpy as jnp
from jax.experimental import pallas as pl
from jax.experimental.pallas import tpu as pltpu


def adaptive_pool_matrix_1d(in_size, out_size):
    """Exact AdaptiveAvgPool bin arithmetic as an (in_size, out_size) matrix."""
    mat = np.zeros((in_size, out_size), dtype=np.float32)
    for o in range(out_size):
        start = (o * in_size) // out_size
        end = -((-(o + 1) * in_size) // out_size)  # ceil((o+1)*in/out)
        mat[start:end, o] = 1.0 / float(end - start)
    return mat


# ----------------------------------------------------------------------------
# In-kernel cosine loss (f32, torch.nn.CosineSimilarity eps semantics).
# ----------------------------------------------------------------------------
def _cosine_loss_rows(feats, n):
    """(1 - cos(x_feats, y_feats)).mean() over rows; returns a (1, 1) f32."""
    xf = feats[:n]
    yf = feats[n:]
    eps = jnp.float32(1e-8)
    dot_xy = jnp.sum(xf * yf, axis=-1, keepdims=True)
    nx = jnp.sqrt(jnp.sum(xf * xf, axis=-1, keepdims=True))
    ny = jnp.sqrt(jnp.sum(yf * yf, axis=-1, keepdims=True))
    cos = dot_xy / (jnp.maximum(nx, eps) * jnp.maximum(ny, eps))
    return jnp.mean(1.0 - cos, axis=0, keepdims=True)


# ----------------------------------------------------------------------------
# Kernel 1 (default): single grid step — one long-K MXU matmul + fused loss.
# ----------------------------------------------------------------------------
def _idloss_single_kernel(xt_ref, w_ref, b_ref, loss_ref, *, n):
    """xt_ref: (b2, K) bf16 | w_ref: (K, E) bf16 | b_ref: (1, E) f32
    loss_ref: (1, 1) f32"""
    feats = jnp.dot(xt_ref[...], w_ref[...], preferred_element_type=jnp.float32)
    feats = feats + b_ref[...]
    loss_ref[...] = _cosine_loss_rows(feats, n)


# ----------------------------------------------------------------------------
# Kernel 2 (large K only): streamed K-reduction with a resident f32 accumulator.
# ----------------------------------------------------------------------------
def _idloss_streamed_kernel(xt_ref, w_ref, b_ref, loss_ref, acc_ref, *, n):
    """One step along the K reduction axis.
    xt_ref: (b2, tk) bf16 | w_ref: (tk, E) bf16 | b_ref: (1, E) f32
    acc_ref: (b2, E) f32 VMEM accumulator (persists across grid steps)."""
    k = pl.program_id(0)

    @pl.when(k == 0)
    def _init():
        # Fold the bias into the accumulator init (saves a finalize add).
        acc_ref[...] = jnp.zeros_like(acc_ref) + b_ref[...]

    acc_ref[...] += jnp.dot(xt_ref[...], w_ref[...],
                            preferred_element_type=jnp.float32)

    @pl.when(k == pl.num_programs(0) - 1)
    def _finalize():
        loss_ref[...] = _cosine_loss_rows(acc_ref[...], n)


def _cosine_loss_ref(xf, yf):
    eps = jnp.float32(1e-8)
    dot_xy = jnp.sum(xf * yf, axis=-1)
    nx = jnp.sqrt(jnp.sum(xf * xf, axis=-1))
    ny = jnp.sqrt(jnp.sum(yf * yf, axis=-1))
    cos = dot_xy / (jnp.maximum(nx, eps) * jnp.maximum(ny, eps))
    return jnp.mean(1.0 - cos)


class IDLossPallas:
    """JAX/Pallas re-implementation of IDLoss.forward (single fused kernel)."""

    def __init__(self, channels=3, height=16, width=16, pool_size=8,
                 embed_dim=512, compute_dtype=jnp.bfloat16, k_block=None,
                 key=None):
        self.C, self.H, self.W = channels, height, width
        self.P, self.E = pool_size, embed_dim
        self.K = channels * height * width
        self.compute_dtype = compute_dtype
        # k_block: None -> single-step kernel (best at these sizes).
        # For very large C*H*W pick a multiple of 256 (v6e/v7x MXU depth;
        # 128 suffices on v5e) that divides K.
        self.k_block = k_block

        key = jax.random.PRNGKey(0) if key is None else key
        k_w, k_b = jax.random.split(key)
        feat_in = channels * pool_size * pool_size
        # TODO(synk): deterministic linear stand-in for the ArcFace IR-SE50 backbone.
        self.w_embed = (
            jax.random.normal(k_w, (channels, pool_size, pool_size, embed_dim),
                              dtype=jnp.float32) / np.sqrt(feat_in)
        )
        self.b_embed = jax.random.normal(k_b, (1, embed_dim),
                                         dtype=jnp.float32) * 0.01

        # Exact AdaptiveAvgPool2d bin matrices, as separable 1D factors.
        self.mh = jnp.asarray(adaptive_pool_matrix_1d(height, pool_size))  # (H,P)
        self.mw = jnp.asarray(adaptive_pool_matrix_1d(width, pool_size))   # (W,P)

        # Fold BOTH pool directions into the embedding weight (exact algebra):
        #   W_comb[(c,h,w), e] = sum_{p,q} Mh[h,p] * Mw[w,q] * Wemb[c,p,q,e]
        w_comb = jnp.einsum("hp,wq,cpqe->chwe", self.mh, self.mw, self.w_embed)
        self.w_comb = w_comb.reshape(self.K, embed_dim)         # (C*H*W, E) f32
        self.w_comb_k = self.w_comb.astype(compute_dtype)       # bf16 MXU copy

    # --- layout helper (no transposes: K = C*H*W is the lane-dense last dim) ---
    def _rows(self, x, y):
        n = x.shape[0]
        xt = jnp.concatenate([x, y], axis=0).reshape(2 * n, self.K)
        return xt.astype(self.compute_dtype), 2 * n, n

    def __call__(self, x, y):
        assert x.shape == y.shape and x.ndim == 4
        assert tuple(x.shape[1:]) == (self.C, self.H, self.W)
        xt, b2, n = self._rows(x, y)

        tk = self.K if self.k_block is None else min(self.k_block, self.K)
        if tk < self.K and (self.K % tk != 0 or tk % 128 != 0):
            tk = self.K                      # fall back to the single-step path
        if tk == self.K:
            return self._call_single(xt, b2, n)
        return self._call_streamed(xt, b2, n, tk)

    # ------------------------- single-step path ---------------------------
    def _call_single(self, xt, b2, n):
        K, E = self.K, self.E
        flops = 2 * b2 * K * E + 8 * b2 * E
        bytes_accessed = (xt.size * xt.dtype.itemsize
                          + self.w_comb_k.size * self.w_comb_k.dtype.itemsize
                          + self.b_embed.size * 4 + 4)
        loss = pl.pallas_call(
            functools.partial(_idloss_single_kernel, n=n),
            out_shape=jax.ShapeDtypeStruct((1, 1), jnp.float32),
            grid_spec=pltpu.PrefetchScalarGridSpec(
                num_scalar_prefetch=0,
                grid=(1,),
                in_specs=[
                    pl.BlockSpec((b2, K), lambda k: (0, 0)),
                    pl.BlockSpec((K, E), lambda k: (0, 0)),
                    pl.BlockSpec((1, E), lambda k: (0, 0)),
                ],
                out_specs=pl.BlockSpec((1, 1), lambda k: (0, 0)),
            ),
            compiler_params=pltpu.CompilerParams(
                dimension_semantics=("arbitrary",)),
            cost_estimate=pl.CostEstimate(
                flops=flops, transcendentals=2 * b2,
                bytes_accessed=bytes_accessed),
        )(xt, self.w_comb_k, self.b_embed)
        return loss[0, 0]

    # ---------------------- streamed K-reduction path ---------------------
    def _call_streamed(self, xt, b2, n, tk):
        K, E = self.K, self.E
        grid = (K // tk,)
        flops = 2 * b2 * K * E + 8 * b2 * E
        bytes_accessed = (xt.size * xt.dtype.itemsize
                          + self.w_comb_k.size * self.w_comb_k.dtype.itemsize
                          + self.b_embed.size * 4 + 4)
        loss = pl.pallas_call(
            functools.partial(_idloss_streamed_kernel, n=n),
            out_shape=jax.ShapeDtypeStruct((1, 1), jnp.float32),
            grid_spec=pltpu.PrefetchScalarGridSpec(
                num_scalar_prefetch=0,
                grid=grid,
                in_specs=[
                    pl.BlockSpec((b2, tk), lambda k: (0, k)),
                    pl.BlockSpec((tk, E), lambda k: (k, 0)),
                    pl.BlockSpec((1, E), lambda k: (0, 0)),
                ],
                out_specs=pl.BlockSpec((1, 1), lambda k: (0, 0)),
                scratch_shapes=[pltpu.VMEM((b2, E), jnp.float32)],
            ),
            compiler_params=pltpu.CompilerParams(
                dimension_semantics=("arbitrary",)),
            cost_estimate=pl.CostEstimate(
                flops=flops, transcendentals=2 * b2,
                bytes_accessed=bytes_accessed),
        )(xt, self.w_comb_k, self.b_embed)
        return loss[0, 0]

    # ------------------------ pure-XLA references -------------------------
    def reference_mirrored(self, x, y):
        """Plain-XLA mirror of the kernel dataflow and dtypes (tight check)."""
        xt, b2, n = self._rows(x, y)
        feats = jnp.dot(xt, self.w_comb_k,
                        preferred_element_type=jnp.float32) + self.b_embed
        return _cosine_loss_ref(feats[:n], feats[n:])

    def reference_f32(self, x, y):
        """Full-f32 reference with the direct (unfolded) semantics:
        AdaptiveAvgPool2d -> flatten -> linear -> (1 - cos).mean()."""
        n = x.shape[0]
        xy = jnp.concatenate([x, y], axis=0).astype(jnp.float32)
        pooled = jnp.einsum("nchw,hp,wq->ncpq", xy, self.mh, self.mw)
        feats = jnp.einsum("ncpq,cpqe->ne", pooled, self.w_embed) + self.b_embed
        return _cosine_loss_ref(feats[:n], feats[n:])


if __name__ == "__main__":
    key = jax.random.PRNGKey(0)
    kx, ky, kp = jax.random.split(key, 3)
    N, C, H, W = 2, 3, 16, 16
    x = jax.random.normal(kx, (N, C, H, W), dtype=jnp.float32)
    y = jax.random.normal(ky, (N, C, H, W), dtype=jnp.float32)

    # Default: single-step fused kernel (grid=(1,), no scratch, no pl.when).
    model = IDLossPallas(channels=C, height=H, width=W, pool_size=8,
                         embed_dim=512, key=kp)
    loss = jax.jit(lambda a, b: model(a, b))(x, y)
    loss = jax.block_until_ready(loss)

    # Tight check against an XLA mirror of the exact kernel dataflow/precision.
    ref_tight = model.reference_mirrored(x, y)
    np.testing.assert_allclose(np.asarray(loss), np.asarray(ref_tight),
                               rtol=1e-3, atol=1e-3)

    # Semantic check against the full-f32 pool -> flatten -> linear -> cosine
    # path (slack covers the bf16 MXU operands used inside the kernel).
    ref_sem = model.reference_f32(x, y)
    np.testing.assert_allclose(np.asarray(loss), np.asarray(ref_sem),
                               rtol=2e-2, atol=2e-2)

    # Also exercise the streamed K-reduction variant (K=768, tk=256 -> 3 steps).
    model_stream = IDLossPallas(channels=C, height=H, width=W, pool_size=8,
                                embed_dim=512, key=kp, k_block=256)
    loss_stream = jax.jit(lambda a, b: model_stream(a, b))(x, y)
    loss_stream = jax.block_until_ready(loss_stream)
    np.testing.assert_allclose(np.asarray(loss_stream), np.asarray(ref_tight),
                               rtol=1e-3, atol=1e-3)

    print("KERNEL_OK")
</pallas_src>

<mosaic_0001>
module attributes {stable_mosaic.version = 11 : i64} {
  func.func @_idloss_single_kernel(%arg0: i32, %arg1: memref<4x768xbf16, #tpu.memory_space<vmem>>, %arg2: memref<768x512xbf16, #tpu.memory_space<vmem>>, %arg3: memref<1x512xf32, #tpu.memory_space<vmem>>, %arg4: memref<1x1xf32, #tpu.memory_space<vmem>>) attributes {dimension_semantics = [#tpu.dimension_semantics<arbitrary>], iteration_bounds = array<i64: 1>, scalar_prefetch = 0 : i64, scratch_operands = 0 : i64, tpu.core_type = #tpu.core_type<tc>, window_params = [{pipeline_mode = #tpu.pipeline_mode<synchronous>, transform_indices = @transform_0, window_bounds = array<i64: 4, 768>}, {pipeline_mode = #tpu.pipeline_mode<synchronous>, transform_indices = @transform_1, window_bounds = array<i64: 768, 512>}, {pipeline_mode = #tpu.pipeline_mode<synchronous>, transform_indices = @transform_2, window_bounds = array<i64: 1, 512>}, {pipeline_mode = #tpu.pipeline_mode<synchronous>, transform_indices = @transform_3, window_bounds = array<i64: 1, 1>}]} {
    %c0 = arith.constant 0 : index
    %c0_0 = arith.constant 0 : index
    %0 = vector.load %arg1[%c0, %c0_0] : memref<4x768xbf16, #tpu.memory_space<vmem>>, vector<4x768xbf16>
    %c0_1 = arith.constant 0 : index
    %c0_2 = arith.constant 0 : index
    %1 = vector.load %arg2[%c0_1, %c0_2] : memref<768x512xbf16, #tpu.memory_space<vmem>>, vector<768x512xbf16>
    %cst = arith.constant dense<0.000000e+00> : vector<4x512xf32>
    %2 = tpu.matmul %0, %1, %cst {dimension_numbers = #tpu.dot_dimension_numbers<[1], [0], [0], [1], [0, 0, 1, 1], [], []>} : vector<4x768xbf16>, vector<768x512xbf16>, vector<4x512xf32> -> vector<4x512xf32>
    %c0_3 = arith.constant 0 : index
    %c0_4 = arith.constant 0 : index
    %3 = vector.load %arg3[%c0_3, %c0_4] : memref<1x512xf32, #tpu.memory_space<vmem>>, vector<1x512xf32>
    %4 = vector.broadcast %3 : vector<1x512xf32> to vector<4x512xf32>
    %5 = arith.addf %2, %4 : vector<4x512xf32>
    %6 = vector.extract_strided_slice %5 {offsets = [0, 0], sizes = [2, 512], strides = [1, 1]} : vector<4x512xf32> to vector<2x512xf32>
    %7 = vector.extract_strided_slice %5 {offsets = [2, 0], sizes = [2, 512], strides = [1, 1]} : vector<4x512xf32> to vector<2x512xf32>
    %8 = arith.mulf %6, %7 : vector<2x512xf32>
    %cst_5 = arith.constant dense<0.000000e+00> : vector<2xf32>
    %9 = vector.multi_reduction <add>, %8, %cst_5 [1] : vector<2x512xf32> to vector<2xf32>
    %10 = vector.shape_cast %9 : vector<2xf32> to vector<2x1xf32>
    %11 = arith.mulf %6, %6 : vector<2x512xf32>
    %cst_6 = arith.constant dense<0.000000e+00> : vector<2xf32>
    %12 = vector.multi_reduction <add>, %11, %cst_6 [1] : vector<2x512xf32> to vector<2xf32>
    %13 = vector.shape_cast %12 : vector<2xf32> to vector<2x1xf32>
    %14 = math.sqrt %13 : vector<2x1xf32>
    %15 = arith.mulf %7, %7 : vector<2x512xf32>
    %cst_7 = arith.constant dense<0.000000e+00> : vector<2xf32>
    %16 = vector.multi_reduction <add>, %15, %cst_7 [1] : vector<2x512xf32> to vector<2xf32>
    %17 = vector.shape_cast %16 : vector<2xf32> to vector<2x1xf32>
    %18 = math.sqrt %17 : vector<2x1xf32>
    %cst_8 = arith.constant 9.99999993E-9 : f32
    %19 = vector.broadcast %cst_8 : f32 to vector<2x1xf32>
    %20 = arith.maximumf %14, %19 : vector<2x1xf32>
    %cst_9 = arith.constant 9.99999993E-9 : f32
    %21 = vector.broadcast %cst_9 : f32 to vector<2x1xf32>
    %22 = arith.maximumf %18, %21 : vector<2x1xf32>
    %23 = arith.mulf %20, %22 : vector<2x1xf32>
    %24 = arith.divf %10, %23 : vector<2x1xf32>
    %cst_10 = arith.constant 1.000000e+00 : f32
    %25 = vector.broadcast %cst_10 : f32 to vector<2x1xf32>
    %26 = arith.subf %25, %24 : vector<2x1xf32>
    %cst_11 = arith.constant dense<0.000000e+00> : vector<1xf32>
    %27 = vector.multi_reduction <add>, %26, %cst_11 [0] : vector<2x1xf32> to vector<1xf32>
    %28 = vector.shape_cast %27 : vector<1xf32> to vector<1x1xf32>
    %cst_12 = arith.constant 2.000000e+00 : f32
    %29 = vector.broadcast %cst_12 : f32 to vector<1x1xf32>
    %30 = arith.divf %28, %29 : vector<1x1xf32>
    %c0_13 = arith.constant 0 : index
    %c0_14 = arith.constant 0 : index
    %31 = vector.load %arg4[%c0_13, %c0_14] : memref<1x1xf32, #tpu.memory_space<vmem>>, vector<1x1xf32>
    tpu.vector_store %arg4[%c0_13, %c0_14], %30 {strides = array<i32>} : memref<1x1xf32, #tpu.memory_space<vmem>>, vector<1x1xf32>,
    return
  }
  func.func @transform_0(%arg0: i32) -> (i32, i32) {
    %c0_i32 = arith.constant 0 : i32
    %c0_i32_0 = arith.constant 0 : i32
    %c0_i32_1 = arith.constant 0 : i32
    return %c0_i32, %c0_i32_0 : i32, i32
  }
  func.func @transform_1(%arg0: i32) -> (i32, i32) {
    %c0_i32 = arith.constant 0 : i32
    %c0_i32_0 = arith.constant 0 : i32
    %c0_i32_1 = arith.constant 0 : i32
    return %c0_i32, %c0_i32_0 : i32, i32
  }
  func.func @transform_2(%arg0: i32) -> (i32, i32) {
    %c0_i32 = arith.constant 0 : i32
    %c0_i32_0 = arith.constant 0 : i32
    %c0_i32_1 = arith.constant 0 : i32
    return %c0_i32, %c0_i32_0 : i32, i32
  }
  func.func @transform_3(%arg0: i32) -> (i32, i32) {
    %c0_i32 = arith.constant 0 : i32
    %c0_i32_0 = arith.constant 0 : i32
    %c0_i32_1 = arith.constant 0 : i32
    return %c0_i32, %c0_i32_0 : i32, i32
  }
}

</mosaic_0001>

<bundles_post_ra>
// kernel: _lambda_.1
= control target key start
LH: loop header
LB: loop body
LE: loop exit
PB: predicated region body
PF: predicated region fallthrough
CT: control target
= control target key end

     0   :  { %8 = vsyncpa [#allocation3], 0  ;;  %s2205_s0 = inlined_call_operand.vmem [shape: bf16[4,768], index: 0, kind: input, shape index: {}]   ;;  %s2206_s1 = inlined_call_operand.hbm [shape: bf16[768,512], index: 1, kind: input, shape index: {}]   ;;  %s2207_s2 = inlined_call_operand.vmem [shape: f32[1,512], index: 2, kind: input, shape index: {}]   ;;  %s2208_s3 = inlined_call_operand.hbm [shape: f32[1,1], index: 3, kind: output, shape index: {}]  }
   0x1   :  { %9 = vsyncpa [#allocation4], 0  ;;  %s2120_s12 = smov [#allocation2]  }
   0x2   :  { %s17_s13 = sshll.u32 %s2120_s12, 4  ;;  %s18_s13 = int_to_ptr.vmem [resolvable:$true] %s17_s13 }
   0x3   :  { %s2084_s14 = scalar_lea.vmem %s18_s13, 24576  ;;  %p2089_p1 = scmp.lt.s32.totalorder %s18_s13, %s18_s13 }
   0x4   :  { %p2085_p0 = scmp.ne.s32.totalorder %s18_s13, %s2084_s14  ;;  %p2090_p2 = scmp.lt.s32.totalorder %s2084_s14, %s2084_s14 }
   0x6   :  { %p2091_p3 = por %p2090_p2, %p2089_p1 }
   0x8   :  { %p2092_p4 = pnand %p2091_p3, %p2085_p0 }
   0xa   :  { %2095 = shalt.err (!%p2092_p4)
}
   0xb   :  { %s2121_s15 = smov 256   ;;  %s2122_s16 = smov 16  }
   0xc   :  { %23 = dma.hbm_to_vmem [thread:$0]  %s2206_s1, 24576, %s18_s13, [#allocation3], %s2121_s15, %s2121_s15, %s2122_s16  }
   0xd   :  { %2116 = dma.done.wait [#allocation3], 24576  }
   0xe   :  { %2117 = vsyncadd [#allocation3], 4294942720  ;;  %v1781_v0 = vld [vmem:[#allocation2 + $0xe4] ss:$16 sps:$4 sm:$0xff]   ;;  %v1785_v2 = vld [vmem:[#allocation2 + $0xe0] ss:$16 sps:$4 sm:$0xff]   ;;  %v225_v36 = vlaneseq }
   0xf   :  { %v1783_v1 = vld [vmem:[#allocation2 + $0x2e4] ss:$16 sps:$4 sm:$0xff]   ;;  %1238 = vmatprep.subr.bf16.mxu0 %v1781_v0  ;;  %v1786_v3 = vld [vmem:[#allocation2 + $0x2e0] ss:$16 sps:$4 sm:$0xff]   ;;  %v2123_v37 = vmov 1983009808  }
  0x10   :  { %1279 = vmatprep.subr.bf16.mxu1 %v1783_v1  ;;  %v1787_v4 = vld [vmem:[#allocation2 + $0xc4] ss:$16 sps:$4 sm:$0xff]   ;;  %1239 = vmatpush1.bf16.msra.mxu0 %v1785_v2  ;;  %v1791_v6 = vld [vmem:[#allocation2 + $0xc0] ss:$16 sps:$4 sm:$0xff]   ;;  %v249_v38 = vunpack.c.l.s4 %v2123_v37  ;;  %v2148_v42 = vshrl.u32 %v225_v36, 7  ;;  %vm1530_vm0 = vcmask 1043458  }
  0x11   :  { %1280 = vmatpush1.bf16.msra.mxu1 %v1786_v3  ;;  %v1789_v5 = vld [vmem:[#allocation2 + $0x2c4] ss:$16 sps:$4 sm:$0xff]   ;;  %1240 = vmatprep.subr.bf16.mxu0 %v1787_v4  ;;  %v1792_v7 = vld [vmem:[#allocation2 + $0x2c0] ss:$16 sps:$4 sm:$0xff]   ;;  %v1919_v37 = vld [vmem:[#allocation2 + $0x2c] ss:$16 sps:$4 sm:$0xff]  }
  0x12   :  { %1281 = vmatprep.subr.bf16.mxu1 %v1789_v5  ;;  %v1793_v8 = vld [vmem:[#allocation2 + $0xa4] ss:$16 sps:$4 sm:$0xff]   ;;  %v1797_v10 = vld [vmem:[#allocation2 + $0xa0] ss:$16 sps:$4 sm:$0xff]   ;;  %v250_v43 = vunpack.c.0.s8 %v249_v38  ;;  %vm1500_vm1 = vcmask 1041408   ;;  %vm1556_vm6 = vcmask 1024  }
  0x13   :  { %v1795_v9 = vld [vmem:[#allocation2 + $0x2a4] ss:$16 sps:$4 sm:$0xff]   ;;  %v1798_v11 = vld [vmem:[#allocation2 + $0x2a0] ss:$16 sps:$4 sm:$0xff]   ;;  %vm1566_vm7 = vcmask 0  }
  0x14   :  { %1241 = vmatpush1.bf16.msra.mxu0 %v1791_v6  ;;  %v1799_v12 = vld [vmem:[#allocation2 + $0x84] ss:$16 sps:$4 sm:$0xff]   ;;  %v1803_v14 = vld [vmem:[#allocation2 + $0x80] ss:$16 sps:$4 sm:$0xff]   ;;  %v253_v49 = vsub.s32 %v250_v43, %v2148_v42 }
  0x15   :  { %1282 = vmatpush1.bf16.msra.mxu1 %v1792_v7  ;;  %1242 = vmatprep.subr.bf16.mxu0 %v1793_v8  ;;  %v1801_v13 = vld [vmem:[#allocation2 + $0x284] ss:$16 sps:$4 sm:$0xff]   ;;  %v1804_v15 = vld [vmem:[#allocation2 + $0x280] ss:$16 sps:$4 sm:$0xff]  }
  0x16   :  { %1283 = vmatprep.subr.bf16.mxu1 %v1795_v9  ;;  %v1805_v16 = vld [vmem:[#allocation2 + $0x64] ss:$16 sps:$4 sm:$0xff]   ;;  %v1809_v18 = vld [vmem:[#allocation2 + $0x60] ss:$16 sps:$4 sm:$0xff]  }
  0x17   :  { %v1807_v17 = vld [vmem:[#allocation2 + $0x264] ss:$16 sps:$4 sm:$0xff]   ;;  %v1810_v19 = vld [vmem:[#allocation2 + $0x260] ss:$16 sps:$4 sm:$0xff]  }
  0x18   :  { %1243 = vmatpush1.bf16.msra.mxu0 %v1797_v10  ;;  %v1811_v20 = vld [vmem:[#allocation2 + $0x44] ss:$16 sps:$4 sm:$0xff]   ;;  %v1815_v22 = vld [vmem:[#allocation2 + $0x40] ss:$16 sps:$4 sm:$0xff]  }
  0x19   :  { %1284 = vmatpush1.bf16.msra.mxu1 %v1798_v11  ;;  %1244 = vmatprep.subr.bf16.mxu0 %v1799_v12  ;;  %v1813_v21 = vld [vmem:[#allocation2 + $0x244] ss:$16 sps:$4 sm:$0xff]   ;;  %v1816_v23 = vld [vmem:[#allocation2 + $0x240] ss:$16 sps:$4 sm:$0xff]  }
  0x1a   :  { %1285 = vmatprep.subr.bf16.mxu1 %v1801_v13  ;;  %v1817_v24 = vld [vmem:[#allocation2 + $0x24] ss:$16 sps:$4 sm:$0xff]   ;;  %v1821_v26 = vld [vmem:[#allocation2 + $0x20] ss:$16 sps:$4 sm:$0xff]   ;;  %v1883_v13 = vld [vmem:[#allocation2 + $0xec] ss:$16 sps:$4 sm:$0xff]  }
  0x1b   :  { %v1819_v25 = vld [vmem:[#allocation2 + $0x224] ss:$16 sps:$4 sm:$0xff]   ;;  %v1822_v27 = vld [vmem:[#allocation2 + $0x220] ss:$16 sps:$4 sm:$0xff]  }
  0x1c   :  { %1245 = vmatpush1.bf16.msra.mxu0 %v1803_v14  ;;  %v1823_v28 = vld [vmem:[#allocation2 + $0x4] ss:$16 sps:$4 sm:$0xff]   ;;  %v1827_v30 = vld [vmem:[#allocation2] ss:$16 sps:$4 sm:$0xff]  }
  0x1d   :  { %1286 = vmatpush1.bf16.msra.mxu1 %v1804_v15  ;;  %1246 = vmatprep.subr.bf16.mxu0 %v1805_v16  ;;  %v1825_v29 = vld [vmem:[#allocation2 + $0x204] ss:$16 sps:$4 sm:$0xff]   ;;  %v1828_v31 = vld [vmem:[#allocation2 + $0x200] ss:$16 sps:$4 sm:$0xff]   ;;  %v1881_v15 = vld [vmem:[#allocation2 + $0xe8] ss:$16 sps:$4 sm:$0xff]  }
  0x1e   :  { %1287 = vmatprep.subr.bf16.mxu1 %v1807_v17  ;;  %v1829_v32 = vld [vmem:[#allocation2 + $0x1e4] ss:$16 sps:$4 sm:$0xff]   ;;  %v1833_v34 = vld [vmem:[#allocation2 + $0x1e0] ss:$16 sps:$4 sm:$0xff]   ;;  %v1889_v17 = vld [vmem:[#allocation2 + $0xcc] ss:$16 sps:$4 sm:$0xff]  }
  0x1f   :  { %v1831_v33 = vld [vmem:[#allocation2 + $0x3e4] ss:$16 sps:$4 sm:$0xff]   ;;  %v1834_v35 = vld [vmem:[#allocation2 + $0x3e0] ss:$16 sps:$4 sm:$0xff]  }
  0x20   :  { %1247 = vmatpush1.bf16.msra.mxu0 %v1809_v18  ;;  %v1835_v39 = vld [vmem:[#allocation2 + $0x1c4] ss:$16 sps:$4 sm:$0xff]   ;;  %v1839_v41 = vld [vmem:[#allocation2 + $0x1c0] ss:$16 sps:$4 sm:$0xff]  }
  0x21   :  { %1288 = vmatpush1.bf16.msra.mxu1 %v1810_v19  ;;  %1248 = vmatprep.subr.bf16.mxu0 %v1811_v20  ;;  %v1837_v40 = vld [vmem:[#allocation2 + $0x3c4] ss:$16 sps:$4 sm:$0xff]   ;;  %v1840_v44 = vld [vmem:[#allocation2 + $0x3c0] ss:$16 sps:$4 sm:$0xff]   ;;  %v1887_v19 = vld [vmem:[#allocation2 + $0xc8] ss:$16 sps:$4 sm:$0xff]  }
  0x22   :  { %1289 = vmatprep.subr.bf16.mxu1 %v1813_v21  ;;  %v1841_v45 = vld [vmem:[#allocation2 + $0x1a4] ss:$16 sps:$4 sm:$0xff]   ;;  %v1845_v47 = vld [vmem:[#allocation2 + $0x1a0] ss:$16 sps:$4 sm:$0xff]   ;;  %v1895_v21 = vld [vmem:[#allocation2 + $0xac] ss:$16 sps:$4 sm:$0xff]  }
  0x23   :  { %v1843_v46 = vld [vmem:[#allocation2 + $0x3a4] ss:$16 sps:$4 sm:$0xff]   ;;  %v1846_v48 = vld [vmem:[#allocation2 + $0x3a0] ss:$16 sps:$4 sm:$0xff]  }
  0x24   :  { %1249 = vmatpush1.bf16.msra.mxu0 %v1815_v22  ;;  %v1847_v50 = vld [vmem:[#allocation2 + $0x184] ss:$16 sps:$4 sm:$0xff]   ;;  %v1851_v53 = vld [vmem:[#allocation2 + $0x180] ss:$16 sps:$4 sm:$0xff]  }
  0x25   :  { %1290 = vmatpush1.bf16.msra.mxu1 %v1816_v23  ;;  %1250 = vmatprep.subr.bf16.mxu0 %v1817_v24  ;;  %v1849_v51 = vld [vmem:[#allocation2 + $0x384] ss:$16 sps:$4 sm:$0xff]   ;;  %v1852_v56 = vld [vmem:[#allocation2 + $0x380] ss:$16 sps:$4 sm:$0xff]   ;;  %v1893_v23 = vld [vmem:[#allocation2 + $0xa8] ss:$16 sps:$4 sm:$0xff]  }
  0x26   :  { %1291 = vmatprep.subr.bf16.mxu1 %v1819_v25  ;;  %v29_v52 = vld [vmem:[%s2205_s0] sm:$0xff]  ;;  %v1901_v25 = vld [vmem:[#allocation2 + $0x8c] ss:$16 sps:$4 sm:$0xff]  }
  0x27   :  { %v2154_v54 = vrot.slane %v29_v52, %v253_v49  ;;  %v247_v55 = vcombine.high %v29_v52, %v29_v52  ;;  %v1853_v57 = vld [vmem:[#allocation2 + $0x164] ss:$16 sps:$4 sm:$0xff]   ;;  %v1857_v61 = vld [vmem:[#allocation2 + $0x160] ss:$16 sps:$4 sm:$0xff]   ;;  %v1937_v52 = vld [vmem:[#allocation2 + $0x1cc] ss:$16 sps:$4 sm:$0xff]  }
  0x28   :  { %1251 = vmatpush1.bf16.msra.mxu0 %v1821_v26  ;;  %v1855_v58 = vld [vmem:[#allocation2 + $0x364] ss:$16 sps:$4 sm:$0xff]   ;;  %v1858_v63 = vld [vmem:[#allocation2 + $0x360] ss:$16 sps:$4 sm:$0xff]  }
  0x29   :  { %1292 = vmatpush1.bf16.msra.mxu1 %v1822_v27  ;;  %1252 = vmatprep.subr.bf16.mxu0 %v1823_v28  ;;  %v262_v59 = vcombine.high %v2154_v54, %v2154_v54  ;;  %v2158_v60 = vrot.slane %v247_v55, %v253_v49  ;;  %v1859_v0 = vld [vmem:[#allocation2 + $0x144] ss:$16 sps:$4 sm:$0xff]   ;;  %v1863_v2 = vld [vmem:[#allocation2 + $0x140] ss:$16 sps:$4 sm:$0xff]   ;;  %v1899_v27 = vld [vmem:[#allocation2 + $0x88] ss:$16 sps:$4 sm:$0xff]  }
  0x2a   :  { %1293 = vmatprep.subr.bf16.mxu1 %v1825_v29  ;;  %v1861_v1 = vld [vmem:[#allocation2 + $0x344] ss:$16 sps:$4 sm:$0xff]   ;;  %v1864_v3 = vld [vmem:[#allocation2 + $0x340] ss:$16 sps:$4 sm:$0xff]   ;;  %v1907_v29 = vld [vmem:[#allocation2 + $0x6c] ss:$16 sps:$4 sm:$0xff]  }
  0x2b   :  { %1270 = vmatprep.mubr.bf16.mxu0 %v262_v59  ;;  %v2162_v62 = vcombine.high %v2158_v60, %v2158_v60  ;;  %v1865_v4 = vld [vmem:[#allocation2 + $0x124] ss:$16 sps:$4 sm:$0xff]   ;;  %v1869_v6 = vld [vmem:[#allocation2 + $0x120] ss:$16 sps:$4 sm:$0xff]   ;;  %v1935_v55 = vld [vmem:[#allocation2 + $0x1c8] ss:$16 sps:$4 sm:$0xff]  }
  0x2c   :  { %1253 = vmatpush1.bf16.msra.mxu0 %v1827_v30  ;;  %v1867_v5 = vld [vmem:[#allocation2 + $0x324] ss:$16 sps:$4 sm:$0xff]   ;;  %v1870_v7 = vld [vmem:[#allocation2 + $0x320] ss:$16 sps:$4 sm:$0xff]  }
  0x2d   :  { %1294 = vmatpush1.bf16.msra.mxu1 %v1828_v31  ;;  %1254 = vmatprep.subr.bf16.mxu0 %v1829_v32  ;;  %v1871_v8 = vld [vmem:[#allocation2 + $0x104] ss:$16 sps:$4 sm:$0xff]   ;;  %v1875_v10 = vld [vmem:[#allocation2 + $0x100] ss:$16 sps:$4 sm:$0xff]   ;;  %v1905_v31 = vld [vmem:[#allocation2 + $0x68] ss:$16 sps:$4 sm:$0xff]  }
  0x2e   :  { %1295 = vmatprep.subr.bf16.mxu1 %v1831_v33  ;;  %1311 = vmatprep.mubr.bf16.mxu1 %v2162_v62  ;;  %v1873_v9 = vld [vmem:[#allocation2 + $0x304] ss:$16 sps:$4 sm:$0xff]   ;;  %v1876_v11 = vld [vmem:[#allocation2 + $0x300] ss:$16 sps:$4 sm:$0xff]   ;;  %v1913_v33 = vld [vmem:[#allocation2 + $0x4c] ss:$16 sps:$4 sm:$0xff]  }
  0x2f   :  { %v1880_v12 = vld [vmem:[#allocation2 + $0x4e4] ss:$16 sps:$4 sm:$0xff]   ;;  %v1878_v14 = vld [vmem:[#allocation2 + $0x4e0] ss:$16 sps:$4 sm:$0xff]  }
  0x30   :  { %1255 = vmatpush2.bf16.msra.mxu0 %v1833_v34  ;;  %v1886_v16 = vld [vmem:[#allocation2 + $0x4c4] ss:$16 sps:$4 sm:$0xff]   ;;  %v1884_v18 = vld [vmem:[#allocation2 + $0x4c0] ss:$16 sps:$4 sm:$0xff]  }
  0x31   :  { %1296 = vmatpush2.bf16.msra.mxu1 %v1834_v35  ;;  %1256 = vmatprep.subr.bf16.mxu0 %v1835_v39  ;;  %v1892_v20 = vld [vmem:[#allocation2 + $0x4a4] ss:$16 sps:$4 sm:$0xff]   ;;  %v1890_v22 = vld [vmem:[#allocation2 + $0x4a0] ss:$16 sps:$4 sm:$0xff]   ;;  %v1911_v35 = vld [vmem:[#allocation2 + $0x48] ss:$16 sps:$4 sm:$0xff]  }
  0x32   :  { %1297 = vmatprep.subr.bf16.mxu1 %v1837_v40  ;;  %v1898_v24 = vld [vmem:[#allocation2 + $0x484] ss:$16 sps:$4 sm:$0xff]   ;;  %v1896_v26 = vld [vmem:[#allocation2 + $0x480] ss:$16 sps:$4 sm:$0xff]  }
  0x33   :  { %v1904_v28 = vld [vmem:[#allocation2 + $0x464] ss:$16 sps:$4 sm:$0xff]   ;;  %v1902_v30 = vld [vmem:[#allocation2 + $0x460] ss:$16 sps:$4 sm:$0xff]  }
  0x34   :  { %1257 = vmatpush2.bf16.msra.mxu0 %v1839_v41  ;;  %v1910_v32 = vld [vmem:[#allocation2 + $0x444] ss:$16 sps:$4 sm:$0xff]   ;;  %v1908_v34 = vld [vmem:[#allocation2 + $0x440] ss:$16 sps:$4 sm:$0xff]   ;;  %v1917_v41 = vld [vmem:[#allocation2 + $0x28] ss:$16 sps:$4 sm:$0xff]  }
  0x35   :  { %1298 = vmatpush2.bf16.msra.mxu1 %v1840_v44  ;;  %1258 = vmatprep.subr.bf16.mxu0 %v1841_v45  ;;  %v1916_v36 = vld [vmem:[#allocation2 + $0x424] ss:$16 sps:$4 sm:$0xff]   ;;  %v2170_v38 = vld.sshfl [vmem:[%s2205_s0 + $0x8] sm:$0x33 pattern:$0x76325410] }
  0x36   :  { %1299 = vmatprep.subr.bf16.mxu1 %v1843_v46  ;;  %v2174_v39 = vcombine.high %v2170_v38, %v2170_v38  ;;  %v1914_v40 = vld [vmem:[#allocation2 + $0x420] ss:$16 sps:$4 sm:$0xff]   ;;  %v1922_v43 = vld [vmem:[#allocation2 + $0x404] ss:$16 sps:$4 sm:$0xff]   ;;  %v1925_v44 = vld [vmem:[#allocation2 + $0xc] ss:$16 sps:$4 sm:$0xff]  }
  0x37   :  { %v1920_v45 = vld [vmem:[#allocation2 + $0x400] ss:$16 sps:$4 sm:$0xff]   ;;  %v1923_v46 = vld [vmem:[#allocation2 + $0x8] ss:$16 sps:$4 sm:$0xff]  }
  0x38   :  { %1259 = vmatpush2.bf16.msra.mxu0 %v1845_v47  ;;  %v1928_v47 = vld [vmem:[#allocation2 + $0x5e4] ss:$16 sps:$4 sm:$0xff]   ;;  %v1926_v49 = vld [vmem:[#allocation2 + $0x5e0] ss:$16 sps:$4 sm:$0xff]  }
  0x39   :  { %1300 = vmatpush2.bf16.msra.mxu1 %v1846_v48  ;;  %1260 = vmatprep.subr.bf16.mxu0 %v1847_v50  ;;  %v1931_v48 = vld [vmem:[#allocation2 + $0x1ec] ss:$16 sps:$4 sm:$0xff]   ;;  %v1929_v50 = vld [vmem:[#allocation2 + $0x1e8] ss:$16 sps:$4 sm:$0xff]  }
  0x3a   :  { %1301 = vmatprep.subr.bf16.mxu1 %v1849_v51  ;;  %v1934_v51 = vld [vmem:[#allocation2 + $0x5c4] ss:$16 sps:$4 sm:$0xff]  }
  0x3c   :  { %1261 = vmatpush2.bf16.msra.mxu0 %v1851_v53  ;;  %v1932_v53 = vld [vmem:[#allocation2 + $0x5c0] ss:$16 sps:$4 sm:$0xff]  }
  0x3d   :  { %1302 = vmatpush2.bf16.msra.mxu1 %v1852_v56  ;;  %1262 = vmatprep.subr.bf16.mxu0 %v1853_v57  ;;  %v1940_v56 = vld [vmem:[#allocation2 + $0x5a4] ss:$16 sps:$4 sm:$0xff]   ;;  %v1943_v57 = vld [vmem:[#allocation2 + $0x1ac] ss:$16 sps:$4 sm:$0xff]  }
  0x3e   :  { %1303 = vmatprep.subr.bf16.mxu1 %v1855_v58  ;;  %v1938_v58 = vld [vmem:[#allocation2 + $0x5a0] ss:$16 sps:$4 sm:$0xff]  }
  0x40   :  { %1263 = vmatpush2.bf16.msra.mxu0 %v1857_v61  ;;  %v1946_v61 = vld [vmem:[#allocation2 + $0x584] ss:$16 sps:$4 sm:$0xff]  }
  0x41   :  { %1304 = vmatpush2.bf16.msra.mxu1 %v1858_v63  ;;  %1264 = vmatprep.subr.bf16.mxu0 %v1859_v0  ;;  %v1949_v63 = vld [vmem:[#allocation2 + $0x18c] ss:$16 sps:$4 sm:$0xff]   ;;  %v1944_v0 = vld [vmem:[#allocation2 + $0x580] ss:$16 sps:$4 sm:$0xff]  }
  0x42   :  { %1305 = vmatprep.subr.bf16.mxu1 %v1861_v1  ;;  %v1947_v1 = vld [vmem:[#allocation2 + $0x188] ss:$16 sps:$4 sm:$0xff]  }
  0x44   :  { %1265 = vmatpush2.bf16.msra.mxu0 %v1863_v2  ;;  %v1952_v2 = vld [vmem:[#allocation2 + $0x564] ss:$16 sps:$4 sm:$0xff]  }
  0x45   :  { %1306 = vmatpush2.bf16.msra.mxu1 %v1864_v3  ;;  %1266 = vmatprep.subr.bf16.mxu0 %v1865_v4  ;;  %v1955_v3 = vld [vmem:[#allocation2 + $0x16c] ss:$16 sps:$4 sm:$0xff]   ;;  %v1950_v4 = vld [vmem:[#allocation2 + $0x560] ss:$16 sps:$4 sm:$0xff]  }
  0x46   :  { %1307 = vmatprep.subr.bf16.mxu1 %v1867_v5  ;;  %v1953_v5 = vld [vmem:[#allocation2 + $0x168] ss:$16 sps:$4 sm:$0xff]  }
  0x48   :  { %1267 = vmatpush2.bf16.msra.mxu0 %v1869_v6  ;;  %v1958_v6 = vld [vmem:[#allocation2 + $0x544] ss:$16 sps:$4 sm:$0xff]  }
  0x49   :  { %1308 = vmatpush2.bf16.msra.mxu1 %v1870_v7  ;;  %1268 = vmatprep.subr.bf16.mxu0 %v1871_v8  ;;  %v1961_v7 = vld [vmem:[#allocation2 + $0x14c] ss:$16 sps:$4 sm:$0xff]   ;;  %v1956_v8 = vld [vmem:[#allocation2 + $0x540] ss:$16 sps:$4 sm:$0xff]  }
  0x4a   :  { %1309 = vmatprep.subr.bf16.mxu1 %v1873_v9  ;;  %v1959_v9 = vld [vmem:[#allocation2 + $0x148] ss:$16 sps:$4 sm:$0xff]  }
  0x4c   :  { %1269 = vmatpush2.bf16.msra.mxu0 %v1875_v10  ;;  %v1964_v10 = vld [vmem:[#allocation2 + $0x524] ss:$16 sps:$4 sm:$0xff]  }
  0x4d   :  { %1310 = vmatpush2.bf16.msra.mxu1 %v1876_v11  ;;  %1320 = vmatprep.subr.bf16.mxu0 %v1880_v12  ;;  %v1967_v11 = vld [vmem:[#allocation2 + $0x12c] ss:$16 sps:$4 sm:$0xff]   ;;  %v1962_v12 = vld [vmem:[#allocation2 + $0x520] ss:$16 sps:$4 sm:$0xff]  }
  0x4e   :  { %1361 = vmatprep.subr.bf16.mxu1 %v1883_v13  ;;  %v1965_v13 = vld [vmem:[#allocation2 + $0x128] ss:$16 sps:$4 sm:$0xff]  }
  0x4f   :  { %1271 = vmatmul.mubr.bf16.vlgmr.msra.gmra.mxu0 %v2154_v54 }
  0x50   :  { %1312 = vmatmul.mubr.bf16.vlgmr.msra.gmra.mxu1 %v2158_v60  ;;  %1321 = vmatpush1.bf16.msra.mxu0 %v1878_v14  ;;  %v1970_v14 = vld [vmem:[#allocation2 + $0x504] ss:$16 sps:$4 sm:$0xff]  }
  0x51   :  { %1362 = vmatpush1.bf16.msra.mxu1 %v1881_v15  ;;  %1322 = vmatprep.subr.bf16.mxu0 %v1886_v16  ;;  %v1973_v15 = vld [vmem:[#allocation2 + $0x10c] ss:$16 sps:$4 sm:$0xff]   ;;  %v1968_v16 = vld [vmem:[#allocation2 + $0x500] ss:$16 sps:$4 sm:$0xff]  }
  0x52   :  { %1363 = vmatprep.subr.bf16.mxu1 %v1889_v17  ;;  %1393 = vmatprep.mubr.bf16.mxu1 %v262_v59  ;;  %v1941_v59 = vld [vmem:[#allocation2 + $0x1a8] ss:$16 sps:$4 sm:$0xff]  }
  0x53   :  { %1352 = vmatprep.mubr.bf16.mxu0 %v2174_v39  ;;  %v1971_v17 = vld [vmem:[#allocation2 + $0x108] ss:$16 sps:$4 sm:$0xff]  }
  0x54   :  { %1323 = vmatpush1.bf16.msra.mxu0 %v1884_v18  ;;  %v1976_v18 = vld [vmem:[#allocation2 + $0x2ec] ss:$16 sps:$4 sm:$0xff]  }
  0x55   :  { %1364 = vmatpush1.bf16.msra.mxu1 %v1887_v19  ;;  %1324 = vmatprep.subr.bf16.mxu0 %v1892_v20  ;;  %v1979_v19 = vld [vmem:[#allocation2 + $0x4ec] ss:$16 sps:$4 sm:$0xff]   ;;  %v1974_v20 = vld [vmem:[#allocation2 + $0x2e8] ss:$16 sps:$4 sm:$0xff]  }
  0x56   :  { %1365 = vmatprep.subr.bf16.mxu1 %v1895_v21  ;;  %v1977_v21 = vld [vmem:[#allocation2 + $0x4e8] ss:$16 sps:$4 sm:$0xff]  }
  0x58   :  { %1325 = vmatpush1.bf16.msra.mxu0 %v1890_v22  ;;  %v1982_v22 = vld [vmem:[#allocation2 + $0x2cc] ss:$16 sps:$4 sm:$0xff]  }
  0x59   :  { %1366 = vmatpush1.bf16.msra.mxu1 %v1893_v23  ;;  %1326 = vmatprep.subr.bf16.mxu0 %v1898_v24  ;;  %v1985_v23 = vld [vmem:[#allocation2 + $0x4cc] ss:$16 sps:$4 sm:$0xff]   ;;  %v1980_v24 = vld [vmem:[#allocation2 + $0x2c8] ss:$16 sps:$4 sm:$0xff]  }
  0x5a   :  { %1367 = vmatprep.subr.bf16.mxu1 %v1901_v25  ;;  %v1983_v25 = vld [vmem:[#allocation2 + $0x4c8] ss:$16 sps:$4 sm:$0xff]  }
  0x5c   :  { %1327 = vmatpush1.bf16.msra.mxu0 %v1896_v26  ;;  %v1988_v26 = vld [vmem:[#allocation2 + $0x2ac] ss:$16 sps:$4 sm:$0xff]  }
  0x5d   :  { %1368 = vmatpush1.bf16.msra.mxu1 %v1899_v27  ;;  %1328 = vmatprep.subr.bf16.mxu0 %v1904_v28  ;;  %v1991_v27 = vld [vmem:[#allocation2 + $0x4ac] ss:$16 sps:$4 sm:$0xff]   ;;  %v1986_v28 = vld [vmem:[#allocation2 + $0x2a8] ss:$16 sps:$4 sm:$0xff]  }
  0x5e   :  { %1369 = vmatprep.subr.bf16.mxu1 %v1907_v29  ;;  %v1989_v29 = vld [vmem:[#allocation2 + $0x4a8] ss:$16 sps:$4 sm:$0xff]  }
  0x60   :  { %1329 = vmatpush1.bf16.msra.mxu0 %v1902_v30  ;;  %v1994_v30 = vld [vmem:[#allocation2 + $0x28c] ss:$16 sps:$4 sm:$0xff]  }
  0x61   :  { %1370 = vmatpush1.bf16.msra.mxu1 %v1905_v31  ;;  %1330 = vmatprep.subr.bf16.mxu0 %v1910_v32  ;;  %v1992_v31 = vld [vmem:[#allocation2 + $0x288] ss:$16 sps:$4 sm:$0xff]  }
  0x62   :  { %1371 = vmatprep.subr.bf16.mxu1 %v1913_v33  ;;  %v1995_v32 = vld [vmem:[#allocation2 + $0x488] ss:$16 sps:$4 sm:$0xff]   ;;  %v2000_v33 = vld [vmem:[#allocation2 + $0x26c] ss:$16 sps:$4 sm:$0xff]  }
  0x64   :  { %1331 = vmatpush1.bf16.msra.mxu0 %v1908_v34  ;;  %v2003_v34 = vld [vmem:[#allocation2 + $0x46c] ss:$16 sps:$4 sm:$0xff]  }
  0x65   :  { %1372 = vmatpush1.bf16.msra.mxu1 %v1911_v35  ;;  %1332 = vmatprep.subr.bf16.mxu0 %v1916_v36  ;;  %v2001_v35 = vld [vmem:[#allocation2 + $0x468] ss:$16 sps:$4 sm:$0xff]   ;;  %v2006_v36 = vld [vmem:[#allocation2 + $0x24c] ss:$16 sps:$4 sm:$0xff]  }
  0x66   :  { %1373 = vmatprep.subr.bf16.mxu1 %v1919_v37  ;;  %v2009_v37 = vld [vmem:[#allocation2 + $0x44c] ss:$16 sps:$4 sm:$0xff]  }
  0x68   :  { %1333 = vmatpush1.bf16.msra.mxu0 %v1914_v40  ;;  %v2007_v40 = vld [vmem:[#allocation2 + $0x448] ss:$16 sps:$4 sm:$0xff]  }
  0x69   :  { %1374 = vmatpush1.bf16.msra.mxu1 %v1917_v41  ;;  %1334 = vmatprep.subr.bf16.mxu0 %v1922_v43  ;;  %v2012_v41 = vld [vmem:[#allocation2 + $0x22c] ss:$16 sps:$4 sm:$0xff]  }
  0x6a   :  { %1375 = vmatprep.subr.bf16.mxu1 %v1925_v44  ;;  %v2015_v43 = vld [vmem:[#allocation2 + $0x42c] ss:$16 sps:$4 sm:$0xff]   ;;  %v2010_v44 = vld [vmem:[#allocation2 + $0x228] ss:$16 sps:$4 sm:$0xff]  }
  0x6c   :  { %1335 = vmatpush1.bf16.msra.mxu0 %v1920_v45  ;;  %v2013_v45 = vld [vmem:[#allocation2 + $0x428] ss:$16 sps:$4 sm:$0xff]  }
  0x6d   :  { %1376 = vmatpush1.bf16.msra.mxu1 %v1923_v46  ;;  %1336 = vmatprep.subr.bf16.mxu0 %v1928_v47  ;;  %v2018_v46 = vld [vmem:[#allocation2 + $0x20c] ss:$16 sps:$4 sm:$0xff]  }
  0x6e   :  { %1377 = vmatprep.subr.bf16.mxu1 %v1931_v48  ;;  %v2021_v47 = vld [vmem:[#allocation2 + $0x40c] ss:$16 sps:$4 sm:$0xff]   ;;  %v2016_v48 = vld [vmem:[#allocation2 + $0x208] ss:$16 sps:$4 sm:$0xff]  }
  0x70   :  { %1337 = vmatpush2.bf16.msra.mxu0 %v1926_v49  ;;  %v2019_v49 = vld [vmem:[#allocation2 + $0x408] ss:$16 sps:$4 sm:$0xff]  }
  0x71   :  { %1378 = vmatpush2.bf16.msra.mxu1 %v1929_v50  ;;  %1338 = vmatprep.subr.bf16.mxu0 %v1934_v51  ;;  %v2024_v50 = vld [vmem:[#allocation2 + $0x3ec] ss:$16 sps:$4 sm:$0xff]  }
  0x72   :  { %1379 = vmatprep.subr.bf16.mxu1 %v1937_v52  ;;  %v2027_v51 = vld [vmem:[#allocation2 + $0x5ec] ss:$16 sps:$4 sm:$0xff]   ;;  %v2022_v52 = vld [vmem:[#allocation2 + $0x3e8] ss:$16 sps:$4 sm:$0xff]  }
  0x74   :  { %1339 = vmatpush2.bf16.msra.mxu0 %v1932_v53  ;;  %v2025_v53 = vld [vmem:[#allocation2 + $0x5e8] ss:$16 sps:$4 sm:$0xff]  }
  0x75   :  { %1380 = vmatpush2.bf16.msra.mxu1 %v1935_v55  ;;  %1340 = vmatprep.subr.bf16.mxu0 %v1940_v56  ;;  %v2030_v55 = vld [vmem:[#allocation2 + $0x3cc] ss:$16 sps:$4 sm:$0xff]  }
  0x76   :  { %1381 = vmatprep.subr.bf16.mxu1 %v1943_v57  ;;  %v2033_v56 = vld [vmem:[#allocation2 + $0x5cc] ss:$16 sps:$4 sm:$0xff]   ;;  %v2028_v57 = vld [vmem:[#allocation2 + $0x3c8] ss:$16 sps:$4 sm:$0xff]  }
  0x78   :  { %1341 = vmatpush2.bf16.msra.mxu0 %v1938_v58  ;;  %v2031_v58 = vld [vmem:[#allocation2 + $0x5c8] ss:$16 sps:$4 sm:$0xff]  }
  0x79   :  { %1382 = vmatpush2.bf16.msra.mxu1 %v1941_v59  ;;  %1342 = vmatprep.subr.bf16.mxu0 %v1946_v61  ;;  %v2036_v59 = vld [vmem:[#allocation2 + $0x3ac] ss:$16 sps:$4 sm:$0xff]  }
  0x7a   :  { %1383 = vmatprep.subr.bf16.mxu1 %v1949_v63  ;;  %v2039_v61 = vld [vmem:[#allocation2 + $0x5ac] ss:$16 sps:$4 sm:$0xff]   ;;  %v2034_v63 = vld [vmem:[#allocation2 + $0x3a8] ss:$16 sps:$4 sm:$0xff]  }
  0x7c   :  { %1343 = vmatpush2.bf16.msra.mxu0 %v1944_v0  ;;  %v2037_v0 = vld [vmem:[#allocation2 + $0x5a8] ss:$16 sps:$4 sm:$0xff]  }
  0x7d   :  { %1384 = vmatpush2.bf16.msra.mxu1 %v1947_v1  ;;  %1344 = vmatprep.subr.bf16.mxu0 %v1952_v2  ;;  %v2042_v1 = vld [vmem:[#allocation2 + $0x38c] ss:$16 sps:$4 sm:$0xff]  }
  0x7e   :  { %1385 = vmatprep.subr.bf16.mxu1 %v1955_v3  ;;  %v2045_v2 = vld [vmem:[#allocation2 + $0x58c] ss:$16 sps:$4 sm:$0xff]   ;;  %v2040_v3 = vld [vmem:[#allocation2 + $0x388] ss:$16 sps:$4 sm:$0xff]  }
  0x80   :  { %1345 = vmatpush2.bf16.msra.mxu0 %v1950_v4  ;;  %v2043_v4 = vld [vmem:[#allocation2 + $0x588] ss:$16 sps:$4 sm:$0xff]  }
  0x81   :  { %1386 = vmatpush2.bf16.msra.mxu1 %v1953_v5  ;;  %1346 = vmatprep.subr.bf16.mxu0 %v1958_v6  ;;  %v2048_v5 = vld [vmem:[#allocation2 + $0x36c] ss:$16 sps:$4 sm:$0xff]  }
  0x82   :  { %1387 = vmatprep.subr.bf16.mxu1 %v1961_v7  ;;  %v2051_v6 = vld [vmem:[#allocation2 + $0x56c] ss:$16 sps:$4 sm:$0xff]   ;;  %v2046_v7 = vld [vmem:[#allocation2 + $0x368] ss:$16 sps:$4 sm:$0xff]  }
  0x84   :  { %1347 = vmatpush2.bf16.msra.mxu0 %v1956_v8  ;;  %v2049_v8 = vld [vmem:[#allocation2 + $0x568] ss:$16 sps:$4 sm:$0xff]  }
  0x85   :  { %1388 = vmatpush2.bf16.msra.mxu1 %v1959_v9  ;;  %1348 = vmatprep.subr.bf16.mxu0 %v1964_v10  ;;  %v2054_v9 = vld [vmem:[#allocation2 + $0x34c] ss:$16 sps:$4 sm:$0xff]  }
  0x86   :  { %1389 = vmatprep.subr.bf16.mxu1 %v1967_v11  ;;  %v2057_v10 = vld [vmem:[#allocation2 + $0x54c] ss:$16 sps:$4 sm:$0xff]   ;;  %v2052_v11 = vld [vmem:[#allocation2 + $0x348] ss:$16 sps:$4 sm:$0xff]  }
  0x88   :  { %1349 = vmatpush2.bf16.msra.mxu0 %v1962_v12  ;;  %v2055_v12 = vld [vmem:[#allocation2 + $0x548] ss:$16 sps:$4 sm:$0xff]  }
  0x89   :  { %1390 = vmatpush2.bf16.msra.mxu1 %v1965_v13  ;;  %1350 = vmatprep.subr.bf16.mxu0 %v1970_v14  ;;  %v2060_v13 = vld [vmem:[#allocation2 + $0x32c] ss:$16 sps:$4 sm:$0xff]  }
  0x8a   :  { %1391 = vmatprep.subr.bf16.mxu1 %v1973_v15  ;;  %v2063_v14 = vld [vmem:[#allocation2 + $0x52c] ss:$16 sps:$4 sm:$0xff]   ;;  %v2058_v15 = vld [vmem:[#allocation2 + $0x328] ss:$16 sps:$4 sm:$0xff]  }
  0x8c   :  { %1351 = vmatpush2.bf16.msra.mxu0 %v1968_v16  ;;  %v2061_v16 = vld [vmem:[#allocation2 + $0x528] ss:$16 sps:$4 sm:$0xff]  }
  0x8d   :  { %1392 = vmatpush2.bf16.msra.mxu1 %v1971_v17  ;;  %1402 = vmatprep.subr.bf16.mxu0 %v1976_v18  ;;  %v2066_v17 = vld [vmem:[#allocation2 + $0x30c] ss:$16 sps:$4 sm:$0xff]  }
  0x8e   :  { %1443 = vmatprep.subr.bf16.mxu1 %v1979_v19  ;;  %v2069_v18 = vld [vmem:[#allocation2 + $0x50c] ss:$16 sps:$4 sm:$0xff]   ;;  %v2064_v19 = vld [vmem:[#allocation2 + $0x308] ss:$16 sps:$4 sm:$0xff]  }
  0x8f   :  { %1353 = vmatmul.mubr.bf16.vlgmr.msra.gmra.mxu0 %v2170_v38 }
  0x90   :  { %1394 = vmatmul.mubr.bf16.vlgmr.msra.gmra.mxu1 %v2154_v54  ;;  %1403 = vmatpush1.bf16.msra.mxu0 %v1974_v20  ;;  %v1997_v54 = vld [vmem:[#allocation2 + $0x48c] ss:$16 sps:$4 sm:$0xff]   ;;  %v2067_v20 = vld [vmem:[#allocation2 + $0x508] ss:$16 sps:$4 sm:$0xff]  }
  0x91   :  { %1444 = vmatpush1.bf16.msra.mxu1 %v1977_v21  ;;  %1404 = vmatprep.subr.bf16.mxu0 %v1982_v22  ;;  %v227_v21 = vsub.s32 0, %v2148_v42  ;;  %v223_v22 = vld [vmem:[%s2207_s2] sm:$0xf]  ;;  %s2124_s2 = smov [#allocation5]  }
  0x92   :  { %1445 = vmatprep.subr.bf16.mxu1 %v1985_v23  ;;  %1434 = vmatprep.mubr.bf16.mxu0 %v2162_v62  ;;  %v1998_v62 = vld [vmem:[#allocation2 + $0x268] ss:$16 sps:$4 sm:$0xff]   ;;  %v231_v23 = vsub.s32 1, %v2148_v42  ;;  %s1574_s23 = sshll.u32 %s2124_s2, 4  ;;  %s1575_s23 = int_to_ptr.vmem [resolvable:$true] %s1574_s23 }
  0x93   :  { %1475 = vmatprep.mubr.bf16.mxu1 %v2174_v39  ;;  %v2004_v39 = vld [vmem:[#allocation2 + $0x248] ss:$16 sps:$4 sm:$0xff]   ;;  %s2096_s24 = scalar_lea.vmem %s1575_s23, 16  ;;  %s2100_s25 = scalar_lea.vmem %s1575_s23, 32 }
  0x94   :  { %1405 = vmatpush1.bf16.msra.mxu0 %v1980_v24  ;;  %v228_v24 = vrot.slane %v223_v22, %v227_v21  ;;  %p2097_p5 = scmp.ne.s32.totalorder %s1575_s23, %s2096_s24  ;;  %p2101_p6 = scmp.lt.s32.totalorder %s1575_s23, %s1575_s23 }
  0x95   :  { %1446 = vmatpush1.bf16.msra.mxu1 %v1983_v25  ;;  %1406 = vmatprep.subr.bf16.mxu0 %v1988_v26  ;;  %v232_v25 = vrot.slane %v223_v22, %v231_v23  ;;  %p2102_p7 = scmp.lt.s32.totalorder %s2100_s25, %s2096_s24 }
  0x96   :  { %1447 = vmatprep.subr.bf16.mxu1 %v1991_v27 }
  0x97   :  { %p2103_p8 = por %p2102_p7, %p2101_p6 }
  0x98   :  { %1407 = vmatpush1.bf16.msra.mxu0 %v1986_v28 }
  0x99   :  { %1448 = vmatpush1.bf16.msra.mxu1 %v1989_v29  ;;  %1408 = vmatprep.subr.bf16.mxu0 %v1994_v30  ;;  %p2104_p9 = pnand %p2103_p8, %p2097_p5 }
  0x9a   :  { %1449 = vmatprep.subr.bf16.mxu1 %v1997_v54 }
  0x9c   :  { %1409 = vmatpush1.bf16.msra.mxu0 %v1992_v31 }
  0x9d   :  { %1450 = vmatpush1.bf16.msra.mxu1 %v1995_v32  ;;  %1410 = vmatprep.subr.bf16.mxu0 %v2000_v33 }
  0x9e   :  { %1451 = vmatprep.subr.bf16.mxu1 %v2003_v34 }
  0xa0   :  { %1411 = vmatpush1.bf16.msra.mxu0 %v1998_v62 }
  0xa1   :  { %1452 = vmatpush1.bf16.msra.mxu1 %v2001_v35  ;;  %1412 = vmatprep.subr.bf16.mxu0 %v2006_v36 }
  0xa2   :  { %1453 = vmatprep.subr.bf16.mxu1 %v2009_v37 }
  0xa4   :  { %1413 = vmatpush1.bf16.msra.mxu0 %v2004_v39 }
  0xa5   :  { %1454 = vmatpush1.bf16.msra.mxu1 %v2007_v40  ;;  %1414 = vmatprep.subr.bf16.mxu0 %v2012_v41 }
  0xa6   :  { %1455 = vmatprep.subr.bf16.mxu1 %v2015_v43 }
  0xa8   :  { %1415 = vmatpush1.bf16.msra.mxu0 %v2010_v44 }
  0xa9   :  { %1456 = vmatpush1.bf16.msra.mxu1 %v2013_v45  ;;  %1416 = vmatprep.subr.bf16.mxu0 %v2018_v46 }
  0xaa   :  { %1457 = vmatprep.subr.bf16.mxu1 %v2021_v47 }
  0xac   :  { %1417 = vmatpush1.bf16.msra.mxu0 %v2016_v48 }
  0xad   :  { %1458 = vmatpush1.bf16.msra.mxu1 %v2019_v49  ;;  %1418 = vmatprep.subr.bf16.mxu0 %v2024_v50 }
  0xae   :  { %1459 = vmatprep.subr.bf16.mxu1 %v2027_v51 }
  0xb0   :  { %1419 = vmatpush2.bf16.msra.mxu0 %v2022_v52 }
  0xb1   :  { %1460 = vmatpush2.bf16.msra.mxu1 %v2025_v53  ;;  %1420 = vmatprep.subr.bf16.mxu0 %v2030_v55 }
  0xb2   :  { %1461 = vmatprep.subr.bf16.mxu1 %v2033_v56 }
  0xb4   :  { %1421 = vmatpush2.bf16.msra.mxu0 %v2028_v57 }
  0xb5   :  { %1462 = vmatpush2.bf16.msra.mxu1 %v2031_v58  ;;  %1422 = vmatprep.subr.bf16.mxu0 %v2036_v59 }
  0xb6   :  { %1463 = vmatprep.subr.bf16.mxu1 %v2039_v61 }
  0xb8   :  { %1423 = vmatpush2.bf16.msra.mxu0 %v2034_v63 }
  0xb9   :  { %1464 = vmatpush2.bf16.msra.mxu1 %v2037_v0  ;;  %1424 = vmatprep.subr.bf16.mxu0 %v2042_v1  ;;  %v235_v0 = vsub.s32 2, %v2148_v42  ;;  %v239_v1 = vsub.s32 3, %v2148_v42 }
  0xba   :  { %1465 = vmatprep.subr.bf16.mxu1 %v2045_v2 }
  0xbb   :  { %v236_v2 = vrot.slane %v223_v22, %v235_v0 }
  0xbc   :  { %1425 = vmatpush2.bf16.msra.mxu0 %v2040_v3  ;;  %v240_v3 = vrot.slane %v223_v22, %v239_v1 }
  0xbd   :  { %1466 = vmatpush2.bf16.msra.mxu1 %v2043_v4  ;;  %1426 = vmatprep.subr.bf16.mxu0 %v2048_v5 }
  0xbe   :  { %1467 = vmatprep.subr.bf16.mxu1 %v2051_v6 }
  0xc0   :  { %1427 = vmatpush2.bf16.msra.mxu0 %v2046_v7 }
  0xc1   :  { %1468 = vmatpush2.bf16.msra.mxu1 %v2049_v8  ;;  %1428 = vmatprep.subr.bf16.mxu0 %v2054_v9 }
  0xc2   :  { %1469 = vmatprep.subr.bf16.mxu1 %v2057_v10 }
  0xc4   :  { %1429 = vmatpush2.bf16.msra.mxu0 %v2052_v11 }
  0xc5   :  { %1470 = vmatpush2.bf16.msra.mxu1 %v2055_v12  ;;  %1430 = vmatprep.subr.bf16.mxu0 %v2060_v13 }
  0xc6   :  { %1471 = vmatprep.subr.bf16.mxu1 %v2063_v14 }
  0xc8   :  { %1431 = vmatpush2.bf16.msra.mxu0 %v2058_v15 }
  0xc9   :  { %1472 = vmatpush2.bf16.msra.mxu1 %v2061_v16  ;;  %1432 = vmatprep.subr.bf16.mxu0 %v2066_v17 }
  0xca   :  { %1473 = vmatprep.subr.bf16.mxu1 %v2069_v18 }
  0xcc   :  { %1433 = vmatpush2.bf16.msra.mxu0 %v2064_v19 }
  0xcd   :  { %1474 = vmatpush2.bf16.msra.mxu1 %v2067_v20 }
  0xcf   :  { %1435 = vmatmul.mubr.bf16.vlgmr.msra.gmra.mxu0 %v2158_v60 }
  0xd0   :  { %1476 = vmatmul.mubr.bf16.vlgmr.msra.gmra.mxu1 %v2170_v38 }
 0x10f   :  { %v1272_v26 = vpop.f32.mrf.mxu0 }
 0x110   :  { %v1313_v27 = vpop.f32.mrf.mxu1  ;;  %v1273_v28 = vadd.f32 %v1272_v26, %v228_v24 }
 0x111   :  { %v1274_v29 = vpop.f32.mrf.mxu0 }
 0x112   :  { %v1315_v30 = vpop.f32.mrf.mxu1  ;;  %v1314_v54 = vadd.f32 %v1313_v27, %v1273_v28  ;;  %v1275_v31 = vadd.f32 %v1274_v29, %v232_v25 }
 0x113   :  { %v1276_v60 = vpop.f32.mrf.mxu0 }
 0x114   :  { %v1317_v32 = vpop.f32.mrf.mxu1  ;;  %v1316_v38 = vadd.f32 %v1315_v30, %v1275_v31 }
 0x115   :  { %v1277_v33 = vpop.f32.mrf.mxu0 }
 0x116   :  { %v1318_v34 = vpop.f32.mrf.mxu1 }
 0x14f   :  { %v1354_v62 = vpop.f32.mrf.mxu0 }
 0x150   :  { %v1395_v35 = vpop.f32.mrf.mxu1  ;;  %v1355_v36 = vadd.f32 %v1354_v62, %v1314_v54 }
 0x151   :  { %v1356_v37 = vpop.f32.mrf.mxu0  ;;  %v1396_v4 = vadd.f32 %v1395_v35, %v236_v2 }
 0x152   :  { %v1397_v39 = vpop.f32.mrf.mxu1  ;;  %v1488_v40 = vrot.slane %v1355_v36, 2  ;;  %v1510_v41 = vmul.f32 %v1355_v36, %v1355_v36  ;;  %v1357_v43 = vadd.f32 %v1356_v37, %v1316_v38 }
 0x153   :  { %v1358_v44 = vpop.f32.mrf.mxu0  ;;  %v1398_v7 = vadd.f32 %v1397_v39, %v240_v3 }
 0x154   :  { %v1399_v45 = vpop.f32.mrf.mxu1  ;;  %v1496_v46 = vmul.f32 %v1488_v40, %v1355_v36  ;;  %v1489_v47 = vrot.slane %v1357_v43, 2  ;;  %v1511_v48 = vmul.f32 %v1357_v43, %v1357_v43  ;;  %v1531_v51 = vsel %vm1530_vm0, %v1510_v41, 0.0 }
 0x155   :  { %v1359_v49 = vpop.f32.mrf.mxu0  ;;  %v1514_v55 = vsel %vm1500_vm1, %v1510_v41, 0.0 }
 0x156   :  { %v1400_v50 = vpop.f32.mrf.mxu1  ;;  %v1497_v52 = vmul.f32 %v1489_v47, %v1357_v43  ;;  %v1532_v53 = vsel %vm1530_vm0, %v1511_v48, 0.0  ;;  %v1515_v56 = vsel %vm1500_vm1, %v1511_v48, 0.0  ;;  %v1501_v59 = vsel %vm1500_vm1, %v1496_v46, 0.0 }
 0x157   :  { %v1533_v57 = vadd.f32 %v1532_v53, %v1531_v51  ;;  %v1516_v58 = vadd.f32 %v1515_v56, %v1514_v55 }
 0x158   :  { %v1502_v61 = vsel %vm1500_vm1, %v1497_v52, 0.0 }
 0x159   :  { %v1503_v63 = vadd.f32 %v1502_v61, %v1501_v59 }
 0x18f   :  { %v1436_v5 = vpop.f32.mrf.mxu0 }
 0x190   :  { %v1477_v6 = vpop.f32.mrf.mxu1  ;;  %v1437_v8 = vadd.f32 %v1436_v5, %v1396_v4 }
 0x191   :  { %v1438_v9 = vpop.f32.mrf.mxu0 }
 0x192   :  { %v1479_v10 = vpop.f32.mrf.mxu1  ;;  %v1478_v11 = vadd.f32 %v1477_v6, %v1437_v8  ;;  %v1439_v12 = vadd.f32 %v1438_v9, %v1398_v7 }
 0x193   :  { %v1440_v13 = vpop.f32.mrf.mxu0 }
 0x194   :  { %v1481_v14 = vpop.f32.mrf.mxu1  ;;  %v1490_v15 = vrot.slane %v1478_v11, 2  ;;  %v1480_v16 = vadd.f32 %v1479_v10, %v1439_v12  ;;  %v1512_v17 = vmul.f32 %v1478_v11, %v1478_v11 }
 0x195   :  { %v1441_v18 = vpop.f32.mrf.mxu0 }
 0x196   :  { %v1482_v19 = vpop.f32.mrf.mxu1  ;;  %v1513_v20 = vmul.f32 %v1480_v16, %v1480_v16  ;;  %v1534_v42 = vsel %vm1530_vm0, %v1512_v17, 0.0  ;;  %v1491_v21 = vrot.slane %v1480_v16, 2  ;;  %v1498_v22 = vmul.f32 %v1490_v15, %v1478_v11 }
 0x197   :  { %v1535_v23 = vadd.f32 %v1534_v42, %v1533_v57  ;;  %v1517_v24 = vsel %vm1500_vm1, %v1512_v17, 0.0 }
 0x198   :  { %v1536_v25 = vsel %vm1530_vm0, %v1513_v20, 0.0  ;;  %v1499_v26 = vmul.f32 %v1491_v21, %v1480_v16  ;;  %v1504_v27 = vsel %vm1500_vm1, %v1498_v22, 0.0  ;;  %v1518_v30 = vadd.f32 %v1517_v24, %v1516_v58 }
 0x199   :  { %v1537_v28 = vadd.f32 %v1536_v25, %v1535_v23  ;;  %v1505_v29 = vadd.f32 %v1504_v27, %v1503_v63  ;;  %v1519_v31 = vsel %vm1500_vm1, %v1513_v20, 0.0 }
 0x19a   :  { %v1506_v54 = vsel %vm1500_vm1, %v1499_v26, 0.0  ;;  %v1520_v32 = vadd.f32 %v1519_v31, %v1518_v30 }
 0x19b   :  { %1538 = vadd.xlane.f32.xlu0 %v1537_v28  ;;  %v1507_v60 = vadd.f32 %v1506_v54, %v1505_v29 }
 0x19d   :  { %1508 = vadd.xlane.f32.xlu1 %v1507_v60 }
 0x19f   :  { %1521 = vadd.xlane.f32.xlu0 %v1520_v32 }
 0x224   :  { %v1539_v38 = vpop.xlane.xlu0 %1538 }
 0x225   :  { %2070 = vrsqrt.f32 %v1539_v38  ;;  %vm1542_vm2 = vcmp.eq.f32.partialorder %v1539_v38, inf  ;;  %v1545_v35 = vand.u32 2147483648, %v1539_v38  ;;  %vm1544_vm3 = vcmp.eq.f32.partialorder %v1539_v38, 0.0 }
 0x226   :  { %v1509_v50 = vpop.xlane.xlu1 %1508 }
 0x228   :  { %v1522_v33 = vpop.xlane.xlu0 %1521 }
 0x229   :  { %2072 = vrsqrt.f32 %v1522_v33  ;;  %vm1525_vm4 = vcmp.eq.f32.partialorder %v1522_v33, inf  ;;  %v1528_v43 = vand.u32 2147483648, %v1522_v33  ;;  %vm1527_vm5 = vcmp.eq.f32.partialorder %v1522_v33, 0.0 }
 0x232   :  { %v2071_v34 = vpop.eup %2070 }
 0x233   :  { %v1541_v62 = vmul.f32 %v2071_v34, %v1539_v38 }
 0x235   :  { %v1543_v36 = vsel %vm1542_vm2, %v1539_v38, %v1541_v62 }
 0x236   :  { %v2073_v37 = vpop.eup %2072  ;;  %v1546_v39 = vsel %vm1544_vm3, %v1545_v35, %v1543_v36 }
 0x237   :  { %v1548_v40 = vmax.f32 %v1546_v39, 1e-08  ;;  %v1524_v41 = vmul.f32 %v2073_v37, %v1522_v33 }
 0x239   :  { %v1526_v44 = vsel %vm1525_vm4, %v1522_v33, %v1524_v41  ;;  %v1550_v46 = vrot.slane %v1548_v40, 2 }
 0x23a   :  { %v1529_v45 = vsel %vm1527_vm5, %v1528_v43, %v1526_v44 }
 0x23b   :  { %v1547_v47 = vmax.f32 %v1529_v45, 1e-08 }
 0x23d   :  { %v1552_v48 = vmul.f32 %v1550_v46, %v1547_v47 }
 0x23f   :  { %2074 = vrcp.f32 %v1552_v48 }
 0x24c   :  { %v2075_v49 = vpop.eup %2074 }
 0x24d   :  { %v1554_v51 = vmul.f32 %v2075_v49, %v1509_v50 }
 0x24f   :  { %v1555_v52 = vsub.f32 1.0, %v1554_v51 }
 0x251   :  { %v1557_v53 = vsel %vm1556_vm6, %v1555_v52, 0.0 }
 0x252   :  { %v1558_v55 = vrot.slane %v1557_v53, 4 }
 0x254   :  { %v1559_v56 = vadd.f32 %v1558_v55, %v1557_v53 }
 0x256   :  { %v1560_v57 = vrot.slane %v1559_v56, 2 }
 0x258   :  { %v1561_v58 = vadd.f32 %v1560_v57, %v1559_v56 }
 0x25a   :  { %v1562_v59 = vrot.slane %v1561_v58, 1 }
 0x25c   :  { %v1563_v61 = vadd.f32 %v1562_v59, %v1561_v58 }
 0x25e   :  { %v1565_v63 = vmul.f32 0.5, %v1563_v61 }
 0x260   :  { %1567 = vst.msk [vmem:[#allocation5] sm:$0x1] %vm1566_vm7, %v1565_v63 }
 0x261   :  { %2107 = shalt.err (!%p2104_p9)
}
 0x262   :  { %1577 = dma.vmem_to_hbm [thread:$0]  %s1575_s23, 16, %s2208_s3, [#allocation4]  }
 0x263   :  { %2118 = dma.done.wait [#allocation4], 16  }
 0x264   :  { %2119 = vsyncadd [#allocation4], 4294967280 }
 0x265   :  { %1581 = vsyncpa [#allocation3], 1 }
 0x266   :  { %1582 = vsyncpa [#allocation4], 1 }

</bundles_post_ra>
